<compile_context>
chip_gen: v5e
topology: v5e:2x2
jax: 0.10.0
libtpu: 0.0.40
codegen_flags: <defaults>
</compile_context>

<pallas_src>
import numpy as np
import jax
import jax.numpy as jnp
from jax.experimental import pallas as pl
from jax.experimental.pallas import tpu as pltpu

_LANES = 128
_SUBLANES = 8
_ROW_ALIGN = 16          # bf16 packs 2 rows per 32-bit sublane -> keep row tiles 16-aligned


def _round_up(x, m):
    return ((x + m - 1) // m) * m


def _cdiv(a, b):
    return -(-a // b)


def _critic_kernel(xs_ref, w1_ref, b1_ref, w2_ref, b2_ref, w3_ref, b3_ref, out_ref):
    # Layer 1: single fused dot over the concatenated [state|action] tile.
    # bf16 operands, f32 accumulation on the MXU; bias + ReLU in f32.
    h1 = jnp.dot(xs_ref[...], w1_ref[...], preferred_element_type=jnp.float32)
    h1 = jnp.maximum(h1 + b1_ref[...], 0.0)

    # Layer 2 on the MXU at full 128-lane width (hidden dims are lane-padded).
    h2 = jnp.dot(h1.astype(jnp.bfloat16), w2_ref[...],
                 preferred_element_type=jnp.float32)
    h2 = jnp.maximum(h2 + b2_ref[...], 0.0)

    # Layer 3 (N=1 head): f32 VPU multiply + XLU lane reduction instead of a
    # wasteful 1-column MXU matmul; b3 rides in from SMEM as a scalar.
    q = jnp.sum(h2 * w3_ref[...], axis=-1, keepdims=True) + b3_ref[0, 0]
    # Output stays (TB, 1); lane-dense relayout intentionally skipped (see header).
    out_ref[...] = jnp.maximum(q, 0.0)


def _critic_dense(state, action, params):
    """Plain-JAX fast path for tiny batches (same bf16-operand / f32-accum math)."""
    w1, b1, w2, b2, w3_row, b3 = params
    xs = jnp.concatenate([state.astype(jnp.float32),
                          action.astype(jnp.float32)], axis=1).astype(jnp.bfloat16)
    h1 = jnp.maximum(jnp.dot(xs, w1, preferred_element_type=jnp.float32) + b1, 0.0)
    h2 = jnp.maximum(jnp.dot(h1.astype(jnp.bfloat16), w2,
                             preferred_element_type=jnp.float32) + b2, 0.0)
    q = jnp.sum(h2 * w3_row, axis=-1, keepdims=True) + b3
    return jnp.maximum(q, 0.0)


def critic_forward(state, action, params, *, tile_batch=4096, min_pallas_batch=64):
    """state: (B, 2*state_size), action: (B, 2*action_size) -> (B, 1)."""
    w1, b1, w2, b2, w3_row, b3 = params
    B = state.shape[0]

    # Small-batch fast path: at B of a few, the custom-call dispatch + batch
    # padding dominates; XLA's fused dot chain wins. Set min_pallas_batch=0 to
    # force the Pallas kernel (used in the self-test below).
    if B < min_pallas_batch:
        return _critic_dense(state, action, params)

    xs = jnp.concatenate([state.astype(jnp.float32),
                          action.astype(jnp.float32)], axis=1).astype(jnp.bfloat16)
    Din = xs.shape[1]
    H0p = w1.shape[1]
    H1p = w2.shape[1]

    # Batch tiling: cap the tile near `tile_batch`, keep it 16-row aligned
    # (bf16 sublane packing), and use an even number of grid steps (>=2) so the
    # "parallel" batch axis shards evenly across both v7x TensorCores.
    B16 = _round_up(B, _ROW_ALIGN)
    if B16 <= _ROW_ALIGN:
        num_steps = 1
    else:
        num_steps = max(2, 2 * _cdiv(_cdiv(B16, tile_batch), 2))
    TB = _round_up(_cdiv(B16, num_steps), _ROW_ALIGN)
    B_pad = TB * num_steps
    if B_pad != B:
        xs = jnp.pad(xs, ((0, B_pad - B), (0, 0)))

    def resident(shape):
        # Same block index every grid step => weight stays VMEM-resident (no re-DMA).
        return pl.BlockSpec(shape, lambda i: (0, 0))

    flops = 2 * B_pad * (Din * H0p + H0p * H1p + H1p)
    bytes_accessed = (2 * (B_pad * Din + Din * H0p + H0p * H1p)   # bf16 tensors
                      + 4 * (H0p + 2 * H1p + 1 + B_pad))          # f32 biases/head/out

    out = pl.pallas_call(
        _critic_kernel,
        out_shape=jax.ShapeDtypeStruct((B_pad, 1), jnp.float32),
        grid=(num_steps,),
        in_specs=[
            pl.BlockSpec((TB, Din), lambda i: (i, 0)),           # xs tile (bf16)
            resident((Din, H0p)),                                # W1 (bf16)
            resident((1, H0p)),                                  # b1 (f32)
            resident((H0p, H1p)),                                # W2 (bf16)
            resident((1, H1p)),                                  # b2 (f32)
            resident((1, H1p)),                                  # W3 as a row (f32)
            pl.BlockSpec(memory_space=pltpu.MemorySpace.SMEM),   # b3 scalar
        ],
        out_specs=pl.BlockSpec((TB, 1), lambda i: (i, 0)),
        compiler_params=pltpu.CompilerParams(
            dimension_semantics=("parallel",)),
        cost_estimate=pl.CostEstimate(
            flops=flops, transcendentals=0, bytes_accessed=bytes_accessed),
    )(xs, w1, b1, w2, b2, w3_row, b3)

    return out[:B]


def init_critic_params(state_size, action_size, hidden_layers, key):
    """Deterministic parameter init mirroring the PyTorch reset_parameters().

    PyTorch stores weight as (out, in); here we store the transpose (in, out),
    zero-padded to 128-lane hidden widths, with the matmul weights pre-cast to
    bf16 (MXU operands). hidden_init uses weight.size()[0] == out_features as
    'fan_in' (module quirk, reproduced faithfully). Biases keep PyTorch's
    default U(-1/sqrt(in), 1/sqrt(in)) and stay f32.
    """
    Ds = 2 * state_size
    Da = 2 * action_size
    input_dim = Ds + Da
    h0, h1 = hidden_layers
    H0p = _round_up(h0, _LANES)
    H1p = _round_up(h1, _LANES)

    k = jax.random.split(key, 6)

    def uniform(kk, shape, lim):
        return jax.random.uniform(kk, shape, jnp.float32, minval=-lim, maxval=lim)

    lim1 = 1.0 / np.sqrt(h0)          # hidden_init(fcs1): weight.size()[0] = out_features
    lim2 = 1.0 / np.sqrt(h1)          # hidden_init(fc2)
    w1 = uniform(k[0], (input_dim, h0), lim1)
    b1 = uniform(k[1], (1, h0), 1.0 / np.sqrt(input_dim))
    w2 = uniform(k[2], (h0, h1), lim2)
    b2 = uniform(k[3], (1, h1), 1.0 / np.sqrt(h0))
    w3 = uniform(k[4], (h1, 1), 3e-3)
    b3 = uniform(k[5], (1, 1), 1.0 / np.sqrt(h1))

    # Zero-pad hidden widths to 128 lanes. Padded cols of b1/b2 and padded rows
    # of w2/w3 are zero, so the padding never leaks into the result
    # (relu(0*x + 0) = 0 feeds zero weights in the next layer).
    def pad_cols(a, n):
        return jnp.pad(a, ((0, 0), (0, n - a.shape[1])))

    w1p = pad_cols(w1, H0p).astype(jnp.bfloat16)                          # (Din, H0p)
    b1p = pad_cols(b1, H0p)                                               # (1, H0p) f32
    w2p = jnp.pad(w2, ((0, H0p - h0), (0, H1p - h1))).astype(jnp.bfloat16)  # (H0p, H1p)
    b2p = pad_cols(b2, H1p)                                               # (1, H1p) f32
    w3_row = pad_cols(w3.T, H1p)                                          # (1, H1p) f32
    return (w1p, b1p, w2p, b2p, w3_row, b3)


def critic_reference(state, action, params):
    """Pure-JAX f32 reference (PyTorch forward semantics; padding is inert)."""
    w1, b1, w2, b2, w3_row, b3 = params
    xs = jnp.concatenate([state.astype(jnp.float32),
                          action.astype(jnp.float32)], axis=1)
    h1 = jnp.maximum(xs @ w1.astype(jnp.float32) + b1, 0.0)
    h2 = jnp.maximum(h1 @ w2.astype(jnp.float32) + b2, 0.0)
    q = h2 @ w3_row.astype(jnp.float32).T + b3
    return jnp.maximum(q, 0.0)


if __name__ == "__main__":
    # Shapes consistent with the module's forward:
    #   state_size=4, action_size=2  => state is (B, 8), action is (B, 4)
    #   (input_dim = 2*state_size + 2*action_size = 12)
    state_size, action_size = 4, 2
    hidden_layers = [32, 32]

    key = jax.random.PRNGKey(0)
    kp, ks, ka = jax.random.split(key, 3)
    params = init_critic_params(state_size, action_size, hidden_layers, kp)

    # --- Case 1: tiny batch (B=2), Pallas path forced so the kernel runs. ---
    state = jax.random.normal(ks, (2, 2 * state_size), dtype=jnp.float32)
    action = jax.random.normal(ka, (2, 2 * action_size), dtype=jnp.float32)
    q = critic_forward(state, action, params, min_pallas_batch=0)
    jax.block_until_ready(q)
    np.testing.assert_allclose(np.asarray(q),
                               np.asarray(critic_reference(state, action, params)),
                               rtol=2e-2, atol=2e-2)
    assert q.shape == (2, 1)

    # --- Case 2: larger batch -> multi-step grid, batch padding exercised. ---
    ks2, ka2 = jax.random.split(jax.random.PRNGKey(1), 2)
    state2 = jax.random.normal(ks2, (300, 2 * state_size), dtype=jnp.float32)
    action2 = jax.random.normal(ka2, (300, 2 * action_size), dtype=jnp.float32)
    q2 = critic_forward(state2, action2, params)
    jax.block_until_ready(q2)
    np.testing.assert_allclose(np.asarray(q2),
                               np.asarray(critic_reference(state2, action2, params)),
                               rtol=2e-2, atol=2e-2)
    assert q2.shape == (300, 1)

    # --- Case 3: default small-batch fast path (plain JAX dispatch). ---
    q3 = critic_forward(state, action, params)
    jax.block_until_ready(q3)
    np.testing.assert_allclose(np.asarray(q3),
                               np.asarray(critic_reference(state, action, params)),
                               rtol=2e-2, atol=2e-2)

    print("KERNEL_OK")
</pallas_src>

<mosaic_0001>
module attributes {stable_mosaic.version = 11 : i64} {
  func.func @_critic_kernel(%arg0: i32, %arg1: memref<16x12xbf16, #tpu.memory_space<vmem>>, %arg2: memref<12x128xbf16, #tpu.memory_space<vmem>>, %arg3: memref<1x128xf32, #tpu.memory_space<vmem>>, %arg4: memref<128x128xbf16, #tpu.memory_space<vmem>>, %arg5: memref<1x128xf32, #tpu.memory_space<vmem>>, %arg6: memref<1x128xf32, #tpu.memory_space<vmem>>, %arg7: memref<1x1xf32, #tpu.memory_space<smem>>, %arg8: memref<16x1xf32, #tpu.memory_space<vmem>>) attributes {dimension_semantics = [#tpu.dimension_semantics<parallel>], iteration_bounds = array<i64: 1>, scalar_prefetch = 0 : i64, scratch_operands = 0 : i64, tpu.core_type = #tpu.core_type<tc>, window_params = [{transform_indices = @transform_0, window_bounds = array<i64: 16, 12>}, {pipeline_mode = #tpu.pipeline_mode<synchronous>, transform_indices = @transform_1, window_bounds = array<i64: 12, 128>}, {pipeline_mode = #tpu.pipeline_mode<synchronous>, transform_indices = @transform_2, window_bounds = array<i64: 1, 128>}, {pipeline_mode = #tpu.pipeline_mode<synchronous>, transform_indices = @transform_3, window_bounds = array<i64: 128, 128>}, {pipeline_mode = #tpu.pipeline_mode<synchronous>, transform_indices = @transform_4, window_bounds = array<i64: 1, 128>}, {pipeline_mode = #tpu.pipeline_mode<synchronous>, transform_indices = @transform_5, window_bounds = array<i64: 1, 128>}, {transform_indices = @transform_6, window_bounds = array<i64: 1, 1>}, {transform_indices = @transform_7, window_bounds = array<i64: 16, 1>}]} {
    %c0 = arith.constant 0 : index
    %c0_0 = arith.constant 0 : index
    %0 = vector.load %arg1[%c0, %c0_0] : memref<16x12xbf16, #tpu.memory_space<vmem>>, vector<16x12xbf16>
    %c0_1 = arith.constant 0 : index
    %c0_2 = arith.constant 0 : index
    %1 = vector.load %arg2[%c0_1, %c0_2] : memref<12x128xbf16, #tpu.memory_space<vmem>>, vector<12x128xbf16>
    %cst = arith.constant dense<0.000000e+00> : vector<16x128xf32>
    %2 = tpu.matmul %0, %1, %cst {dimension_numbers = #tpu.dot_dimension_numbers<[1], [0], [0], [1], [0, 0, 1, 1], [], []>} : vector<16x12xbf16>, vector<12x128xbf16>, vector<16x128xf32> -> vector<16x128xf32>
    %c0_3 = arith.constant 0 : index
    %c0_4 = arith.constant 0 : index
    %3 = vector.load %arg3[%c0_3, %c0_4] : memref<1x128xf32, #tpu.memory_space<vmem>>, vector<1x128xf32>
    %4 = vector.broadcast %3 : vector<1x128xf32> to vector<16x128xf32>
    %5 = arith.addf %2, %4 : vector<16x128xf32>
    %cst_5 = arith.constant 0.000000e+00 : f32
    %6 = vector.broadcast %cst_5 : f32 to vector<16x128xf32>
    %7 = arith.maximumf %5, %6 : vector<16x128xf32>
    %8 = arith.truncf %7 : vector<16x128xf32> to vector<16x128xbf16>
    %c0_6 = arith.constant 0 : index
    %c0_7 = arith.constant 0 : index
    %9 = vector.load %arg4[%c0_6, %c0_7] : memref<128x128xbf16, #tpu.memory_space<vmem>>, vector<128x128xbf16>
    %cst_8 = arith.constant dense<0.000000e+00> : vector<16x128xf32>
    %10 = tpu.matmul %8, %9, %cst_8 {dimension_numbers = #tpu.dot_dimension_numbers<[1], [0], [0], [1], [0, 0, 1, 1], [], []>} : vector<16x128xbf16>, vector<128x128xbf16>, vector<16x128xf32> -> vector<16x128xf32>
    %c0_9 = arith.constant 0 : index
    %c0_10 = arith.constant 0 : index
    %11 = vector.load %arg5[%c0_9, %c0_10] : memref<1x128xf32, #tpu.memory_space<vmem>>, vector<1x128xf32>
    %12 = vector.broadcast %11 : vector<1x128xf32> to vector<16x128xf32>
    %13 = arith.addf %10, %12 : vector<16x128xf32>
    %cst_11 = arith.constant 0.000000e+00 : f32
    %14 = vector.broadcast %cst_11 : f32 to vector<16x128xf32>
    %15 = arith.maximumf %13, %14 : vector<16x128xf32>
    %c0_12 = arith.constant 0 : index
    %c0_13 = arith.constant 0 : index
    %16 = vector.load %arg6[%c0_12, %c0_13] : memref<1x128xf32, #tpu.memory_space<vmem>>, vector<1x128xf32>
    %17 = vector.broadcast %16 : vector<1x128xf32> to vector<16x128xf32>
    %18 = arith.mulf %15, %17 : vector<16x128xf32>
    %cst_14 = arith.constant dense<0.000000e+00> : vector<16xf32>
    %19 = vector.multi_reduction <add>, %18, %cst_14 [1] : vector<16x128xf32> to vector<16xf32>
    %20 = vector.shape_cast %19 : vector<16xf32> to vector<16x1xf32>
    %c0_15 = arith.constant 0 : index
    %c0_16 = arith.constant 0 : index
    %21 = memref.load %arg7[%c0_15, %c0_16] : memref<1x1xf32, #tpu.memory_space<smem>>
    %22 = vector.broadcast %21 : f32 to vector<16x1xf32>
    %23 = arith.addf %20, %22 : vector<16x1xf32>
    %cst_17 = arith.constant 0.000000e+00 : f32
    %24 = vector.broadcast %cst_17 : f32 to vector<16x1xf32>
    %25 = arith.maximumf %23, %24 : vector<16x1xf32>
    %c0_18 = arith.constant 0 : index
    %c0_19 = arith.constant 0 : index
    %26 = vector.load %arg8[%c0_18, %c0_19] : memref<16x1xf32, #tpu.memory_space<vmem>>, vector<16x1xf32>
    tpu.vector_store %arg8[%c0_18, %c0_19], %25 {strides = array<i32>} : memref<16x1xf32, #tpu.memory_space<vmem>>, vector<16x1xf32>,
    return
  }
  func.func @transform_0(%arg0: i32) -> (i32, i32) {
    %c0_i32 = arith.constant 0 : i32
    %c0_i32_0 = arith.constant 0 : i32
    return %arg0, %c0_i32 : i32, i32
  }
  func.func @transform_1(%arg0: i32) -> (i32, i32) {
    %c0_i32 = arith.constant 0 : i32
    %c0_i32_0 = arith.constant 0 : i32
    %c0_i32_1 = arith.constant 0 : i32
    return %c0_i32, %c0_i32_0 : i32, i32
  }
  func.func @transform_2(%arg0: i32) -> (i32, i32) {
    %c0_i32 = arith.constant 0 : i32
    %c0_i32_0 = arith.constant 0 : i32
    %c0_i32_1 = arith.constant 0 : i32
    return %c0_i32, %c0_i32_0 : i32, i32
  }
  func.func @transform_3(%arg0: i32) -> (i32, i32) {
    %c0_i32 = arith.constant 0 : i32
    %c0_i32_0 = arith.constant 0 : i32
    %c0_i32_1 = arith.constant 0 : i32
    return %c0_i32, %c0_i32_0 : i32, i32
  }
  func.func @transform_4(%arg0: i32) -> (i32, i32) {
    %c0_i32 = arith.constant 0 : i32
    %c0_i32_0 = arith.constant 0 : i32
    %c0_i32_1 = arith.constant 0 : i32
    return %c0_i32, %c0_i32_0 : i32, i32
  }
  func.func @transform_5(%arg0: i32) -> (i32, i32) {
    %c0_i32 = arith.constant 0 : i32
    %c0_i32_0 = arith.constant 0 : i32
    %c0_i32_1 = arith.constant 0 : i32
    return %c0_i32, %c0_i32_0 : i32, i32
  }
  func.func @transform_6(%arg0: i32) -> (i32, i32) {
    %c0_i32 = arith.constant 0 : i32
    %c0_i32_0 = arith.constant 0 : i32
    %c0_i32_1 = arith.constant 0 : i32
    return %c0_i32, %c0_i32_0 : i32, i32
  }
  func.func @transform_7(%arg0: i32) -> (i32, i32) {
    %c0_i32 = arith.constant 0 : i32
    %c0_i32_0 = arith.constant 0 : i32
    return %arg0, %c0_i32 : i32, i32
  }
}

</mosaic_0001>

<bundles_post_ra>
// kernel: tpu_custom_call.1
= control target key start
LH: loop header
LB: loop body
LE: loop exit
PB: predicated region body
PF: predicated region fallthrough
CT: control target
= control target key end

     0   :  { %13 = vsyncpa [#allocation4], 0  ;;  %s434_s0 = inlined_call_operand.hbm [shape: bf16[16,12], index: 0, kind: input, shape index: {}]   ;;  %s435_s1 = inlined_call_operand.hbm [shape: bf16[12,128], index: 1, kind: input, shape index: {}]   ;;  %s436_s2 = inlined_call_operand.vmem [shape: f32[1,128], index: 2, kind: input, shape index: {}]   ;;  %s437_s3 = inlined_call_operand.hbm [shape: bf16[128,128], index: 3, kind: input, shape index: {}]   ;;  %s438_s4 = inlined_call_operand.vmem [shape: f32[1,128], index: 4, kind: input, shape index: {}]   ;;  %s439_s5 = inlined_call_operand.vmem [shape: f32[1,128], index: 5, kind: input, shape index: {}]   ;;  %s440_s6 = inlined_call_operand.<no memory space> [shape: f32[1,1], index: 6, kind: input, shape index: {}]   ;;  %s441_s7 = inlined_call_operand.vmem [shape: f32[16,1], index: 7, kind: output, shape index: {}]  }
   0x1   :  { %14 = vsyncpa [#allocation6], 0  ;;  %s32_s26 = sshll.u32 %s435_s1, 4  ;;  %s362_s27 = smov [#allocation5]   ;;  %s33_s26 = int_to_ptr.hbm [resolvable:$true] %s32_s26 }
   0x2   :  { %s34_s28 = sshll.u32 %s362_s27, 4  ;;  %s19_s8 = sshll.u32 %s434_s0, 4  ;;  %s35_s28 = int_to_ptr.vmem [resolvable:$true] %s34_s28  ;;  %s20_s8 = int_to_ptr.hbm [resolvable:$true] %s19_s8 }
   0x3   :  { %s363_s9 = smov 64   ;;  %s364_s10 = smov 4  }
   0x4   :  { %40 = dma.hbm_to_vmem [thread:$0]  %s33_s26, 128, %s35_s28, [#allocation6], %s363_s9, %s363_s9, %s364_s10  }
   0x5   :  { %s365_s11 = smov [#allocation3]   ;;  %s47_s15 = sshll.u32 %s437_s3, 4  ;;  %s48_s15 = int_to_ptr.hbm [resolvable:$true] %s47_s15 }
   0x6   :  { %s21_s12 = sshll.u32 %s365_s11, 4  ;;  %s366_s1 = smov [#allocation7]   ;;  %s22_s12 = int_to_ptr.vmem [resolvable:$true] %s21_s12 }
   0x7   :  { %27 = dma.hbm_to_vmem [thread:$0]  %s20_s8, 128, %s22_s12, [#allocation4], %s363_s9, %s363_s9, %s364_s10  }
   0x8   :  { %s49_s16 = sshll.u32 %s366_s1, 4  ;;  %s50_s16 = int_to_ptr.vmem [resolvable:$true] %s49_s16 }
   0x9   :  { %55 = dma.hbm_to_vmem [thread:$0]  %s48_s15, 1024, %s50_s16, [#allocation6], %s363_s9, %s363_s9, %s364_s10  }
   0xa   :  { %358 = dma.done.wait [#allocation4], 128  }
   0xb   :  { %359 = vsyncadd [#allocation4], 4294967168 }
   0xc   :  { %360 = dma.done.wait [#allocation6], 1152  }
   0xd   :  { %361 = vsyncadd [#allocation6], 4294966144  ;;  %v233_v0 = vld [vmem:[#allocation5] sm:$0xf]  ;;  %v269_v1 = vld [vmem:[#allocation5] sm:$0x30]  ;;  %v213_v31 = vstv %s440_s6 }
   0xe   :  { %vm97_vm0 = vcmask 1045504   ;;  %v234_v2 = vor.u32 %v269_v1, %v233_v0  ;;  %v277_v3 = vld [vmem:[#allocation7 + $0x38] sm:$0xff]  ;;  %v268_v4 = vld [vmem:[#allocation3] sm:$0xff]  ;;  %vm93_vm1 = vcmask 97280   ;;  %v275_v7 = vld [vmem:[#allocation7 + $0x28] sm:$0xff]  ;;  %vm218_vm2 = vcmask 7168  }
   0xf   :  { %186 = vmatpush.bf16.msra.mxu1 %v277_v3  ;;  %v276_v6 = vld [vmem:[#allocation7 + $0x30] sm:$0xff]  ;;  %v274_v8 = vld [vmem:[#allocation7 + $0x20] sm:$0xff]  ;;  %v273_v9 = vld [vmem:[#allocation7 + $0x18] sm:$0xff] }
  0x10   :  { %v99_v5 = vsel %vm97_vm0, %v234_v2, 0  ;;  %v272_v10 = vld [vmem:[#allocation7 + $0x10] sm:$0xff]  ;;  %v271_v11 = vld [vmem:[#allocation7 + $0x8] sm:$0xff]  ;;  %v270_v12 = vld [vmem:[#allocation7] sm:$0xff] }
  0x11   :  { %108 = vmatpush.bf16.msra.mxu0 %v99_v5  ;;  %v283_v14 = vld [vmem:[%s436_s2] ss:$0 sm:$0xff] }
  0x12   :  { %v284_v21 = vld [vmem:[%s438_s4] ss:$0 sm:$0xff] }
  0x13   :  { %187 = vmatpush.bf16.msra.mxu1 %v276_v6  ;;  %v285_v24 = vld [vmem:[%s439_s5] ss:$0 sm:$0xff] }
  0x14   :  { %235 = vmatmul.msk.bf16.vlgmr.msra.gmra.mxu0 %vm93_vm1, %v268_v4 }
  0x17   :  { %188 = vmatpush.bf16.msra.mxu1 %v275_v7 }
  0x1b   :  { %189 = vmatpush.bf16.msra.mxu1 %v274_v8 }
  0x1f   :  { %190 = vmatpush.bf16.msra.mxu1 %v273_v9 }
  0x23   :  { %191 = vmatpush.bf16.msra.mxu1 %v272_v10 }
  0x27   :  { %192 = vmatpush.bf16.msra.mxu1 %v271_v11 }
  0x2b   :  { %193 = vmatpush.bf16.msra.mxu1 %v270_v12 }
  0x91   :  { %v110_v13 = vpop.f32.mrf.mxu0 }
  0x92   :  { %v111_v15 = vadd.f32 %v283_v14, %v110_v13 }
  0x94   :  { %v115_v18 = vmax.f32 %v111_v15, 0.0 }
  0x99   :  { %v112_v16 = vpop.f32.mrf.mxu0 }
  0x9a   :  { %v113_v17 = vadd.f32 %v283_v14, %v112_v16 }
  0x9c   :  { %v116_v19 = vmax.f32 %v113_v17, 0.0 }
  0x9e   :  { %v117_v20 = vpack.c.bf16 %v116_v19, %v115_v18 }
  0xa0   :  { %194 = vmatmul.bf16.vlgmr.msra.gmra.mxu1 %v117_v20 }
 0x11d   :  { %v195_v22 = vpop.f32.mrf.mxu1 }
 0x11e   :  { %v196_v23 = vadd.f32 %v284_v21, %v195_v22 }
 0x120   :  { %v200_v25 = vmax.f32 %v196_v23, 0.0 }
 0x122   :  { %v206_v26 = vmul.f32 %v285_v24, %v200_v25 }
 0x124   :  { %208 = vadd.xlane.f32.xlu0 %v206_v26 }
 0x125   :  { %v197_v27 = vpop.f32.mrf.mxu1 }
 0x126   :  { %v198_v28 = vadd.f32 %v284_v21, %v197_v27 }
 0x128   :  { %v201_v29 = vmax.f32 %v198_v28, 0.0 }
 0x12a   :  { %v207_v30 = vmul.f32 %v285_v24, %v201_v29 }
 0x12c   :  { %210 = vadd.xlane.f32.xlu0 %v207_v30 }
 0x197   :  { %v209_v32 = vpop.xlane.xlu0 %208 }
 0x198   :  { %v214_v33 = vadd.f32 %v213_v31, %v209_v32 }
 0x19a   :  { %v216_v34 = vmax.f32 %v214_v33, 0.0 }
 0x19c   :  { %219 = vst.msk [vmem:[%s441_s7] sm:$0xff] %vm218_vm2, %v216_v34 }
 0x19f   :  { %v211_v35 = vpop.xlane.xlu0 %210 }
 0x1a0   :  { %v215_v36 = vadd.f32 %v213_v31, %v211_v35 }
 0x1a2   :  { %v217_v37 = vmax.f32 %v215_v36, 0.0 }
 0x1a4   :  { %220 = vst.msk [vmem:[%s441_s7 + $0x8] sm:$0xff] %vm218_vm2, %v217_v37 }
 0x1a5   :  { %225 = vsyncpa [#allocation4], 1 }
 0x1a6   :  { %226 = vsyncpa [#allocation6], 1 }

</bundles_post_ra>
